<compile_context>
chip_gen: v6e
topology: v6e:2x2x1
jax: 0.10.0
libtpu: 0.0.40
codegen_flags: <defaults>
</compile_context>

<pallas_src>
import jax
import jax.numpy as jnp
from jax.experimental import pallas as pl
from jax.experimental.pallas import tpu as pltpu


_NEG_BIG = -1e30  # bias fill for lane-padded (invalid) output columns


def _round_up(x, m):
    return ((x + m - 1) // m) * m


def _linear_softmax_kernel(x_ref, wt_ref, b_ref, o_ref):
    # x_ref  : (TILE_B, D_in)   VMEM  (batch tile, streamed / pipelined)
    # wt_ref : (D_in, H_pad)    VMEM  (pre-transposed weights, resident)
    # b_ref  : (1, H_pad)       VMEM  (bias, padded cols = -1e30, resident)
    # o_ref  : (TILE_B, H_pad)  VMEM  (lane-dense output tile)
    x = x_ref[...]
    wt = wt_ref[...]
    b = b_ref[...]

    # Linear: x @ W^T + b. W is already transposed in the wrapper, so the MXU
    # gets a direct (M,K)x(K,N) matmul — no in-kernel XLU transpose.
    logits = jnp.dot(x, wt, preferred_element_type=jnp.float32) + b

    # Numerically stable softmax over the feature axis (all math in f32).
    # Padded columns carry a -1e30 bias, so exp() underflows to exactly 0 and
    # they never contribute to the denominator.  Exact division (not the
    # approximate EUP reciprocal) so each row sums to 1 to f32 rounding; the
    # kernel is memory-bound, so this costs nothing.
    m = jnp.max(logits, axis=1, keepdims=True)
    e = jnp.exp(logits - m)
    denom = jnp.sum(e, axis=1, keepdims=True)
    o_ref[...] = (e / denom).astype(o_ref.dtype)


def torch_model_forward(x, w, b, *, tile_b=512):
    """y_pred = softmax(x @ w.T + b, axis=1), computed in a Pallas TPU kernel.

    x: (batch, input_size), w: (hidden, input_size), b: (hidden,).
    Reproduces the y=None branch of TorchModel.forward.
    """
    batch, d_in = x.shape
    hidden = w.shape[0]

    # Lane-dense output: pad the feature axis up to a multiple of 128 so output
    # stores are unmasked full-lane vst and the writeback DMA is contiguous.
    h_pad = _round_up(max(hidden, 128), 128)

    # One-time parameter prep outside the kernel (stays out of the hot loop).
    wt = jnp.zeros((d_in, h_pad), jnp.float32)
    wt = wt.at[:, :hidden].set(w.astype(jnp.float32).T)
    b_pad = jnp.full((1, h_pad), _NEG_BIG, jnp.float32)
    b_pad = b_pad.at[0, :hidden].set(b.astype(jnp.float32).reshape(-1))

    # Batch tiling (f32 sublane => multiple of 8). Pad the batch so the grid
    # divides evenly; padded rows are sliced off below.
    tile_b = min(tile_b, _round_up(batch, 8))
    b_rows = _round_up(batch, tile_b)
    x_f32 = x.astype(jnp.float32)
    if b_rows != batch:
        x_f32 = jnp.pad(x_f32, ((0, b_rows - batch), (0, 0)))

    grid = (b_rows // tile_b,)
    out = pl.pallas_call(
        _linear_softmax_kernel,
        out_shape=jax.ShapeDtypeStruct((b_rows, h_pad), jnp.float32),
        grid_spec=pltpu.PrefetchScalarGridSpec(
            num_scalar_prefetch=0,
            grid=grid,
            in_specs=[
                pl.BlockSpec((tile_b, d_in), lambda i: (i, 0)),   # x: streamed per tile
                pl.BlockSpec((d_in, h_pad), lambda i: (0, 0)),    # W^T: resident
                pl.BlockSpec((1, h_pad), lambda i: (0, 0)),       # bias: resident
            ],
            out_specs=pl.BlockSpec((tile_b, h_pad), lambda i: (i, 0)),
        ),
        compiler_params=pltpu.CompilerParams(
            # Batch axis is embarrassingly parallel -> sharded across the two
            # TensorCores on v7x; harmless on single-TC v5e/v6e.
            dimension_semantics=("parallel",),
            # Explicit VMEM budget with headroom; tile footprint here is far
            # below this even on v7x's 64 MiB VMEM.
            vmem_limit_bytes=48 * 1024 * 1024,
        ),
    )(x_f32, wt, b_pad)

    # Drop batch padding and the lane-padded (invalid) feature columns.
    return out[:batch, :hidden]


if __name__ == "__main__":
    # Small shapes consistent with the module: x (batch, input_size), hidden_size=4.
    batch, input_size, hidden_size = 8, 32, 4

    key = jax.random.PRNGKey(0)
    kx, kw, kb = jax.random.split(key, 3)

    x = jax.random.normal(kx, (batch, input_size), dtype=jnp.float32)
    # Deterministic synthetic parameters (shapes match nn.Linear(input_size, hidden_size)).
    w = jax.random.normal(kw, (hidden_size, input_size), dtype=jnp.float32) * 0.1
    b = jax.random.normal(kb, (hidden_size,), dtype=jnp.float32) * 0.1

    fwd = jax.jit(torch_model_forward)
    y_pred = jax.block_until_ready(fwd(x, w, b))

    # Sanity check vs. plain-JAX reference.
    ref = jax.nn.softmax(x @ w.T + b, axis=1)
    assert y_pred.shape == (batch, hidden_size)
    assert jnp.allclose(y_pred, ref, atol=1e-5, rtol=1e-5)
    assert jnp.allclose(jnp.sum(y_pred, axis=1), 1.0, atol=1e-5)

    print("KERNEL_OK")
</pallas_src>

<mosaic_0001>
module attributes {stable_mosaic.version = 11 : i64} {
  func.func @_linear_softmax_kernel(%arg0: i32, %arg1: memref<8x32xf32, #tpu.memory_space<vmem>>, %arg2: memref<32x128xf32, #tpu.memory_space<vmem>>, %arg3: memref<1x128xf32, #tpu.memory_space<vmem>>, %arg4: memref<8x128xf32, #tpu.memory_space<vmem>>) attributes {dimension_semantics = [#tpu.dimension_semantics<parallel>], iteration_bounds = array<i64: 1>, scalar_prefetch = 0 : i64, scratch_operands = 0 : i64, tpu.core_type = #tpu.core_type<tc>, window_params = [{transform_indices = @transform_0, window_bounds = array<i64: 8, 32>}, {pipeline_mode = #tpu.pipeline_mode<synchronous>, transform_indices = @transform_1, window_bounds = array<i64: 32, 128>}, {pipeline_mode = #tpu.pipeline_mode<synchronous>, transform_indices = @transform_2, window_bounds = array<i64: 1, 128>}, {transform_indices = @transform_3, window_bounds = array<i64: 8, 128>}]} {
    %c0 = arith.constant 0 : index
    %c0_0 = arith.constant 0 : index
    %0 = vector.load %arg1[%c0, %c0_0] : memref<8x32xf32, #tpu.memory_space<vmem>>, vector<8x32xf32>
    %c0_1 = arith.constant 0 : index
    %c0_2 = arith.constant 0 : index
    %1 = vector.load %arg2[%c0_1, %c0_2] : memref<32x128xf32, #tpu.memory_space<vmem>>, vector<32x128xf32>
    %c0_3 = arith.constant 0 : index
    %c0_4 = arith.constant 0 : index
    %2 = vector.load %arg3[%c0_3, %c0_4] : memref<1x128xf32, #tpu.memory_space<vmem>>, vector<1x128xf32>
    %cst = arith.constant dense<0.000000e+00> : vector<8x128xf32>
    %3 = tpu.matmul %0, %1, %cst {dimension_numbers = #tpu.dot_dimension_numbers<[1], [0], [0], [1], [0, 0, 1, 1], [], []>} : vector<8x32xf32>, vector<32x128xf32>, vector<8x128xf32> -> vector<8x128xf32>
    %4 = vector.broadcast %2 : vector<1x128xf32> to vector<8x128xf32>
    %5 = arith.addf %3, %4 : vector<8x128xf32>
    %cst_5 = arith.constant dense<0xFF800000> : vector<8xf32>
    %6 = vector.multi_reduction <maximumf>, %5, %cst_5 [1] : vector<8x128xf32> to vector<8xf32>
    %7 = vector.shape_cast %6 : vector<8xf32> to vector<8x1xf32>
    %8 = vector.broadcast %7 : vector<8x1xf32> to vector<8x128xf32>
    %9 = arith.subf %5, %8 : vector<8x128xf32>
    %10 = math.exp %9 : vector<8x128xf32>
    %cst_6 = arith.constant dense<0.000000e+00> : vector<8xf32>
    %11 = vector.multi_reduction <add>, %10, %cst_6 [1] : vector<8x128xf32> to vector<8xf32>
    %12 = vector.shape_cast %11 : vector<8xf32> to vector<8x1xf32>
    %13 = vector.broadcast %12 : vector<8x1xf32> to vector<8x128xf32>
    %14 = arith.divf %10, %13 : vector<8x128xf32>
    %c0_7 = arith.constant 0 : index
    %c0_8 = arith.constant 0 : index
    %15 = vector.load %arg4[%c0_7, %c0_8] : memref<8x128xf32, #tpu.memory_space<vmem>>, vector<8x128xf32>
    tpu.vector_store %arg4[%c0_7, %c0_8], %14 {strides = array<i32>} : memref<8x128xf32, #tpu.memory_space<vmem>>, vector<8x128xf32>,
    return
  }
  func.func @transform_0(%arg0: i32) -> (i32, i32) {
    %c0_i32 = arith.constant 0 : i32
    %c0_i32_0 = arith.constant 0 : i32
    return %arg0, %c0_i32 : i32, i32
  }
  func.func @transform_1(%arg0: i32) -> (i32, i32) {
    %c0_i32 = arith.constant 0 : i32
    %c0_i32_0 = arith.constant 0 : i32
    %c0_i32_1 = arith.constant 0 : i32
    return %c0_i32, %c0_i32_0 : i32, i32
  }
  func.func @transform_2(%arg0: i32) -> (i32, i32) {
    %c0_i32 = arith.constant 0 : i32
    %c0_i32_0 = arith.constant 0 : i32
    %c0_i32_1 = arith.constant 0 : i32
    return %c0_i32, %c0_i32_0 : i32, i32
  }
  func.func @transform_3(%arg0: i32) -> (i32, i32) {
    %c0_i32 = arith.constant 0 : i32
    %c0_i32_0 = arith.constant 0 : i32
    return %arg0, %c0_i32 : i32, i32
  }
}

</mosaic_0001>

<bundles_post_ra>
// kernel: torch_model_forward.1
= control target key start
LH: loop header
LB: loop body
LE: loop exit
PB: predicated region body
PF: predicated region fallthrough
CT: control target
= control target key end

     0   :  { %v138_v0 = vmov 0.0   ;;  %vm139_vm0 = vmmov 0   ;;  %vm26_vm1 = vcmask 261120   ;;  %s181_s1 = inlined_call_operand.vmem [shape: f32[32,128], index: 1, kind: input, shape index: {}]   ;;  %s182_s0 = inlined_call_operand.vmem [shape: f32[8,32], index: 0, kind: input, shape index: {}]   ;;  %s183_s2 = inlined_call_operand.vmem [shape: f32[1,128], index: 2, kind: input, shape index: {}]   ;;  %s184_s3 = inlined_call_operand.vmem [shape: f32[8,128], index: 3, kind: output, shape index: {}]  }
   0x1   :  { %121 = vmatprep.subr.mxu0 %v138_v0  ;;  %v18_v1 = vld [vmem:[%s181_s1 + $0x18] sm:$0xff]  ;;  %v17_v2 = vld [vmem:[%s181_s1 + $0x10] sm:$0xff]  ;;  %129 = vmatprep.mubr.msk.f32.mxu0 %vm139_vm0, %v138_v0  ;;  %v16_v3 = vld [vmem:[%s181_s1 + $0x8] sm:$0xff] }
   0x2   :  { %122 = vmatpush3.msra.mxu0 %v18_v1  ;;  %v15_v4 = vld [vmem:[%s181_s1] sm:$0xff] }
   0x3   :  { %123 = vmatprep.subr.mxu0 %v138_v0  ;;  %v14_v5 = vld [vmem:[%s182_s0] sm:$0xff] }
   0x4   :  { %124 = vmatpush3.msra.mxu0 %v17_v2  ;;  %v114_v6 = vld [vmem:[%s183_s2] ss:$0 sm:$0xff] }
   0x5   :  { %125 = vmatprep.subr.mxu0 %v138_v0 }
   0x6   :  { %126 = vmatpush3.msra.mxu0 %v16_v3 }
   0x7   :  { %127 = vmatprep.subr.mxu0 %v138_v0 }
   0x8   :  { %128 = vmatpush3.msra.mxu0 %v15_v4 }
   0x9   :  { %130 = vmatmul.mubr.msk.f32.vlgmr.msra.gmra.mxu0 %vm26_vm1, %v14_v5 }
  0xc9   :  { %v96_v7 = vpop.f32.mrf.mxu0 }
  0xca   :  { %v97_v8 = vadd.f32 %v114_v6, %v96_v7 }
  0xcb   :  { %v131_v9 = vpop.f32.mrf.mxu0 }
  0xcc   :  { %100 = vmax.xlane.f32.xlu0 %v97_v8 }
 0x155   :  { %v101_v10 = vpop.xlane.xlu0 %100 }
 0x156   :  { %v102_v11 = vsub.f32 %v97_v8, %v101_v10 }
 0x158   :  { %v103_v12 = vmul.f32 1.442695, %v102_v11 }
 0x15a   :  { %134 = vpow2.f32 %v103_v12 }
 0x167   :  { %v135_v13 = vpop.eup %134 }
 0x168   :  { %105 = vadd.xlane.f32.xlu0 %v135_v13 }
 0x1f1   :  { %v106_v14 = vpop.xlane.xlu0 %105 }
 0x1f2   :  { %136 = vrcp.f32 %v106_v14 }
 0x1ff   :  { %v137_v15 = vpop.eup %136 }
 0x200   :  { %v108_v16 = vmul.f32 %v137_v15, %v135_v13 }
 0x202   :  { %109 = vst [vmem:[%s184_s3] sm:$0xff] %v108_v16 }

</bundles_post_ra>
